<compile_context>
chip_gen: v6e
topology: v6e:2x2x1
jax: 0.10.0
libtpu: 0.0.40
codegen_flags: <defaults>
</compile_context>

<pallas_src>
import numpy as np
import jax
import jax.numpy as jnp
from jax.experimental import pallas as pl
from jax.experimental.pallas import tpu as pltpu

_HP = 128  # lane-dense internal / output channel width


# ----------------------------- Pallas kernel --------------------------------
def cyclenet_scb_kernel(scb_ref, wmats_ref, wvecs_ref, out_ref):
    # scb_ref  : [TB, E, BETA]  f32, |SCB| with E on sublanes, BETA on lanes
    # wmats_ref: [5, 128, 128]  f32 packed square weights (zero-padded)
    # wvecs_ref: [8, 128]       f32 packed bias / rank-1 weight rows
    # out_ref  : [TB, E, 128]   f32 lane-dense output (real width H in [:H])
    scb = scb_ref[...]
    tb, e, beta_dim = scb.shape
    hp = wvecs_ref.shape[-1]

    w1b = wmats_ref[0]
    w2h = wmats_ref[1]
    w2b = wmats_ref[2]
    w3a = wmats_ref[3]
    w3b = wmats_ref[4]

    w1a = wvecs_ref[0]
    b1a = wvecs_ref[1]
    b1b = wvecs_ref[2]
    b2a = wvecs_ref[3]
    w2x = wvecs_ref[4]
    b2b = wvecs_ref[5]
    b3a = wvecs_ref[6]
    b3b = wvecs_ref[7]

    # ---- per-cycle scalar path (tiny: TB*BETA rows) -------------------------
    # torch: L1.sum(dim=1) == sum over edges -> per-cycle scalar
    s = jnp.sum(scb, axis=1)[:, :, None]                      # [TB, BETA, 1]
    # Linear(1,64): depth-1 contraction -> VPU broadcast-multiply (not MXU)
    h = jnp.maximum(s * w1a + b1a, 0.0)                       # [TB, BETA, 128]
    h = h.reshape(tb * beta_dim, hp)
    h = jnp.dot(h, w1b, preferred_element_type=jnp.float32) + b1b
    # first Linear(65,128): h-part on the MXU, scalar-SCB part handled below
    pre_h = jnp.dot(h, w2h, preferred_element_type=jnp.float32) + b2a
    pre_h = pre_h.reshape(tb, beta_dim, hp)

    # ---- per-edge path: accumulate over cycles without materializing --------
    # the [BETA, E, 128] intermediate; only a [TB, E, 128] accumulator is live.
    acc = jnp.zeros((tb, e, hp), jnp.float32)
    for b in range(beta_dim):                                 # static unroll
        scb_b = scb[:, :, b][:, :, None]                      # [TB, E, 1]
        ph_b = pre_h[:, b, :][:, None, :]                     # [TB, 1, 128]
        acc = acc + jnp.maximum(ph_b + scb_b * w2x, 0.0)      # [TB, E, 128]

    acc = acc.reshape(tb * e, hp)
    # second Linear(128,128); the beta-sum picks up BETA copies of its bias
    emb = (jnp.dot(acc, w2b, preferred_element_type=jnp.float32)
           + jnp.float32(beta_dim) * b2b)                     # [TB*E, 128]
    # SCB_encoder4 (zero-padded to 128 lanes -> lane-dense matmuls and store)
    o = jnp.maximum(jnp.dot(emb, w3a, preferred_element_type=jnp.float32) + b3a, 0.0)
    o = jnp.dot(o, w3b, preferred_element_type=jnp.float32) + b3b
    out_ref[...] = o.reshape(tb, e, hp).astype(out_ref.dtype)


# ------------------------- weight packing (host side) ------------------------
def _pack_params(params):
    """Pack the 13 small weights into 2 lane-dense (128-wide) f32 slabs."""
    f32 = jnp.float32

    def pad2(w, r, c):
        w = w.astype(f32)
        return jnp.pad(w, ((0, r - w.shape[0]), (0, c - w.shape[1])))

    wmats = jnp.stack([
        pad2(params["w1b"], _HP, _HP),   # [64,64]   -> [128,128]
        pad2(params["w2h"], _HP, _HP),   # [64,128]  -> [128,128]
        pad2(params["w2b"], _HP, _HP),   # [128,128]
        pad2(params["w3a"], _HP, _HP),   # [128,H]   -> [128,128]
        pad2(params["w3b"], _HP, _HP),   # [H,H]     -> [128,128]
    ], axis=0)                           # [5,128,128]

    def vec(name):
        v = params[name].astype(f32).reshape(1, -1)
        return pad2(v, 1, _HP)[0]

    wvecs = jnp.stack([vec("w1a"), vec("b1a"), vec("b1b"), vec("b2a"),
                       vec("w2x"), vec("b2b"), vec("b3a"), vec("b3b")],
                      axis=0)            # [8,128]
    return wmats, wvecs


def _choose_tb(B, E):
    # Fill the MXU M dimension (~256 rows of TB*E) but keep >= 2 grid steps
    # when possible so the 2 TensorCores of a v7x chip both get work.
    tb = max(1, min(B, 256 // max(E, 1)))
    if B >= 2:
        tb = min(tb, pl.cdiv(B, 2))
    return max(tb, 1)


# ------------------------------- entry point ---------------------------------
def cyclenet_scb_encode(scb, params, *, tb=None):
    """scb: [B, BETA, E] float32 padded dense |SCB| tensor -> [B, E, H]."""
    B, BETA, E = scb.shape
    H = params["w3b"].shape[1]

    # host-side transpose: E -> sublanes, BETA -> lanes inside the kernel
    scb_t = jnp.transpose(scb.astype(jnp.float32), (0, 2, 1))   # [B, E, BETA]

    if tb is None:
        tb = _choose_tb(B, E)
    Bp = pl.cdiv(B, tb) * tb
    if Bp != B:
        scb_t = jnp.pad(scb_t, ((0, Bp - B), (0, 0), (0, 0)))

    wmats, wvecs = _pack_params(params)

    out = pl.pallas_call(
        cyclenet_scb_kernel,
        out_shape=jax.ShapeDtypeStruct((Bp, E, _HP), jnp.float32),
        grid_spec=pltpu.PrefetchScalarGridSpec(
            num_scalar_prefetch=0,
            grid=(Bp // tb,),
            in_specs=[
                pl.BlockSpec((tb, E, BETA), lambda b: (b, 0, 0)),
                pl.BlockSpec(wmats.shape, lambda b: (0, 0, 0)),
                pl.BlockSpec(wvecs.shape, lambda b: (0, 0)),
            ],
            out_specs=pl.BlockSpec((tb, E, _HP), lambda b: (b, 0, 0)),
        ),
        compiler_params=pltpu.CompilerParams(
            dimension_semantics=("parallel",),
            vmem_limit_bytes=32 * 1024 * 1024,
        ),
    )(scb_t, wmats, wvecs)

    return out[:B, :, :H]


# --------------------------- plain-JAX reference ----------------------------
def reference_scb_encode(scb, params):
    """Mirrors the PyTorch code verbatim on the padded arrays."""
    B, BETA, E = scb.shape
    L1 = jnp.transpose(scb, (0, 2, 1))[..., None]                  # [B, E, BETA, 1]
    s = L1.sum(axis=1)                                             # [B, BETA, 1]
    h = jnp.maximum(s @ params["w1a"] + params["b1a"], 0.0)
    h = h @ params["w1b"] + params["b1b"]                          # [B, BETA, 64]
    h = jnp.broadcast_to(h[:, None], (B, E, BETA, 64))
    x = jnp.concatenate([h, L1], axis=-1)                          # [B, E, BETA, 65]
    w2 = jnp.concatenate([params["w2h"], params["w2x"]], axis=0)   # [65, 128]
    y = jnp.maximum(x @ w2 + params["b2a"], 0.0)
    y = y @ params["w2b"] + params["b2b"]                          # [B, E, BETA, 128]
    y = y.sum(axis=2)                                              # [B, E, 128]
    o = jnp.maximum(y @ params["w3a"] + params["b3a"], 0.0)
    return o @ params["w3b"] + params["b3b"]                       # [B, E, H]


# ------------------------------ glue helpers ---------------------------------
def pad_scb(x, edgelen, betalen):
    """JAX port of pad_SCB: pad [beta, edge] -> [betalen, edgelen], edge mask."""
    beta, edge = x.shape
    new_x = jnp.zeros((betalen, edgelen), dtype=x.dtype).at[:beta, :edge].set(x)
    mask = np.zeros((edgelen,), dtype=bool)
    mask[:edge] = True
    return new_x, mask


def init_params(key, n_hid):
    dims = {
        "w1a": (1, 64),   "b1a": (1, 64),
        "w1b": (64, 64),  "b1b": (1, 64),
        "w2h": (64, 128), "w2x": (1, 128), "b2a": (1, 128),
        "w2b": (128, 128), "b2b": (1, 128),
        "w3a": (128, n_hid), "b3a": (1, n_hid),
        "w3b": (n_hid, n_hid), "b3b": (1, n_hid),
    }
    params = {}
    for name, shape in dims.items():
        key, sub = jax.random.split(key)
        scale = 0.1 if name.startswith("w") else 0.01
        params[name] = (scale * jax.random.normal(sub, shape)).astype(jnp.float32)
    return params


# --------------------------------- main --------------------------------------
if __name__ == "__main__":
    key = jax.random.PRNGKey(0)
    n_hid = 32                      # edge_dim == n_hid in CycleNet.__init__

    # synthetic hodge_emb: per-graph dense |he[2]| matrices of shape [beta, edge]
    key, k0, k1 = jax.random.split(key, 3)
    scb_g0 = jnp.abs(jax.random.normal(k0, (5, 12))).astype(jnp.float32)
    scb_g1 = jnp.abs(jax.random.normal(k1, (8, 16))).astype(jnp.float32)
    graphs = [scb_g0, scb_g1]

    max_beta = max(g.shape[0] for g in graphs)   # 8
    max_edge = max(g.shape[1] for g in graphs)   # 16

    padded, masks = [], []
    for g in graphs:
        p, m = pad_scb(g, max_edge, max_beta)
        padded.append(p)
        masks.append(m)
    scb = jnp.stack(padded, axis=0)              # [B, BETA, E] = [2, 8, 16]
    pad_masks = np.concatenate(masks)            # [B * E]

    key, kp = jax.random.split(key)
    params = init_params(kp, n_hid)

    out = cyclenet_scb_encode(scb, params)       # [B, E, H]
    out = jax.block_until_ready(out)

    ref = jax.block_until_ready(reference_scb_encode(scb, params))
    if not np.allclose(np.asarray(out), np.asarray(ref), rtol=1e-4, atol=1e-4):
        raise AssertionError("Pallas kernel disagrees with reference")

    # PyTorch: L1 = encoder_out.reshape(B * max_edge, -1)[Pad_Masks]
    L1_full = np.asarray(out).reshape(-1, n_hid)
    L1 = L1_full[pad_masks]                      # [num_real_edges_total, n_hid]
    assert L1.shape == (int(pad_masks.sum()), n_hid)

    print("KERNEL_OK")
</pallas_src>

<mosaic_0001>
module attributes {stable_mosaic.version = 11 : i64} {
  func.func @cyclenet_scb_kernel(%arg0: i32, %arg1: memref<1x16x8xf32, #tpu.memory_space<vmem>>, %arg2: memref<5x128x128xf32, #tpu.memory_space<vmem>>, %arg3: memref<8x128xf32, #tpu.memory_space<vmem>>, %arg4: memref<1x16x128xf32, #tpu.memory_space<vmem>>) attributes {dimension_semantics = [#tpu.dimension_semantics<parallel>], iteration_bounds = array<i64: 2>, scalar_prefetch = 0 : i64, scratch_operands = 0 : i64, tpu.core_type = #tpu.core_type<tc>, window_params = [{transform_indices = @transform_0, window_bounds = array<i64: 1, 16, 8>}, {pipeline_mode = #tpu.pipeline_mode<synchronous>, transform_indices = @transform_1, window_bounds = array<i64: 5, 128, 128>}, {pipeline_mode = #tpu.pipeline_mode<synchronous>, transform_indices = @transform_2, window_bounds = array<i64: 8, 128>}, {transform_indices = @transform_3, window_bounds = array<i64: 1, 16, 128>}]} {
    %c0 = arith.constant 0 : index
    %c0_0 = arith.constant 0 : index
    %c0_1 = arith.constant 0 : index
    %0 = vector.load %arg1[%c0, %c0_0, %c0_1] : memref<1x16x8xf32, #tpu.memory_space<vmem>>, vector<1x16x8xf32>
    %c0_2 = arith.constant 0 : index
    %c0_3 = arith.constant 0 : index
    %c0_4 = arith.constant 0 : index
    %1 = vector.load %arg2[%c0_2, %c0_3, %c0_4] : memref<5x128x128xf32, #tpu.memory_space<vmem>>, vector<1x128x128xf32>
    %2 = vector.shape_cast %1 : vector<1x128x128xf32> to vector<128x128xf32>
    %c1 = arith.constant 1 : index
    %c0_5 = arith.constant 0 : index
    %c0_6 = arith.constant 0 : index
    %3 = vector.load %arg2[%c1, %c0_5, %c0_6] : memref<5x128x128xf32, #tpu.memory_space<vmem>>, vector<1x128x128xf32>
    %4 = vector.shape_cast %3 : vector<1x128x128xf32> to vector<128x128xf32>
    %c2 = arith.constant 2 : index
    %c0_7 = arith.constant 0 : index
    %c0_8 = arith.constant 0 : index
    %5 = vector.load %arg2[%c2, %c0_7, %c0_8] : memref<5x128x128xf32, #tpu.memory_space<vmem>>, vector<1x128x128xf32>
    %6 = vector.shape_cast %5 : vector<1x128x128xf32> to vector<128x128xf32>
    %c3 = arith.constant 3 : index
    %c0_9 = arith.constant 0 : index
    %c0_10 = arith.constant 0 : index
    %7 = vector.load %arg2[%c3, %c0_9, %c0_10] : memref<5x128x128xf32, #tpu.memory_space<vmem>>, vector<1x128x128xf32>
    %8 = vector.shape_cast %7 : vector<1x128x128xf32> to vector<128x128xf32>
    %c4 = arith.constant 4 : index
    %c0_11 = arith.constant 0 : index
    %c0_12 = arith.constant 0 : index
    %9 = vector.load %arg2[%c4, %c0_11, %c0_12] : memref<5x128x128xf32, #tpu.memory_space<vmem>>, vector<1x128x128xf32>
    %10 = vector.shape_cast %9 : vector<1x128x128xf32> to vector<128x128xf32>
    %c0_13 = arith.constant 0 : index
    %c0_14 = arith.constant 0 : index
    %11 = vector.load %arg3[%c0_13, %c0_14] : memref<8x128xf32, #tpu.memory_space<vmem>>, vector<1x128xf32>
    %12 = vector.shape_cast %11 : vector<1x128xf32> to vector<128xf32>
    %c1_15 = arith.constant 1 : index
    %c0_16 = arith.constant 0 : index
    %13 = vector.load %arg3[%c1_15, %c0_16] : memref<8x128xf32, #tpu.memory_space<vmem>>, vector<1x128xf32>
    %14 = vector.shape_cast %13 : vector<1x128xf32> to vector<128xf32>
    %c2_17 = arith.constant 2 : index
    %c0_18 = arith.constant 0 : index
    %15 = vector.load %arg3[%c2_17, %c0_18] : memref<8x128xf32, #tpu.memory_space<vmem>>, vector<1x128xf32>
    %16 = vector.shape_cast %15 : vector<1x128xf32> to vector<128xf32>
    %c3_19 = arith.constant 3 : index
    %c0_20 = arith.constant 0 : index
    %17 = vector.load %arg3[%c3_19, %c0_20] : memref<8x128xf32, #tpu.memory_space<vmem>>, vector<1x128xf32>
    %18 = vector.shape_cast %17 : vector<1x128xf32> to vector<128xf32>
    %c4_21 = arith.constant 4 : index
    %c0_22 = arith.constant 0 : index
    %19 = vector.load %arg3[%c4_21, %c0_22] : memref<8x128xf32, #tpu.memory_space<vmem>>, vector<1x128xf32>
    %20 = vector.shape_cast %19 : vector<1x128xf32> to vector<128xf32>
    %c5 = arith.constant 5 : index
    %c0_23 = arith.constant 0 : index
    %21 = vector.load %arg3[%c5, %c0_23] : memref<8x128xf32, #tpu.memory_space<vmem>>, vector<1x128xf32>
    %22 = vector.shape_cast %21 : vector<1x128xf32> to vector<128xf32>
    %c6 = arith.constant 6 : index
    %c0_24 = arith.constant 0 : index
    %23 = vector.load %arg3[%c6, %c0_24] : memref<8x128xf32, #tpu.memory_space<vmem>>, vector<1x128xf32>
    %24 = vector.shape_cast %23 : vector<1x128xf32> to vector<128xf32>
    %c7 = arith.constant 7 : index
    %c0_25 = arith.constant 0 : index
    %25 = vector.load %arg3[%c7, %c0_25] : memref<8x128xf32, #tpu.memory_space<vmem>>, vector<1x128xf32>
    %26 = vector.shape_cast %25 : vector<1x128xf32> to vector<128xf32>
    %cst = arith.constant dense<0.000000e+00> : vector<1x8xf32>
    %27 = vector.multi_reduction <add>, %0, %cst [1] : vector<1x16x8xf32> to vector<1x8xf32>
    %28 = vector.shape_cast %27 : vector<1x8xf32> to vector<1x8x1xf32>
    %29 = vector.shape_cast %12 : vector<128xf32> to vector<1x1x128xf32>
    %30 = vector.broadcast %28 : vector<1x8x1xf32> to vector<1x8x128xf32>
    %31 = vector.broadcast %29 : vector<1x1x128xf32> to vector<1x8x128xf32>
    %32 = arith.mulf %30, %31 : vector<1x8x128xf32>
    %33 = vector.shape_cast %14 : vector<128xf32> to vector<1x1x128xf32>
    %34 = vector.broadcast %33 : vector<1x1x128xf32> to vector<1x8x128xf32>
    %35 = arith.addf %32, %34 : vector<1x8x128xf32>
    %cst_26 = arith.constant 0.000000e+00 : f32
    %36 = vector.broadcast %cst_26 : f32 to vector<1x8x128xf32>
    %37 = arith.maximumf %35, %36 : vector<1x8x128xf32>
    %38 = vector.shape_cast %37 : vector<1x8x128xf32> to vector<8x128xf32>
    %cst_27 = arith.constant dense<0.000000e+00> : vector<8x128xf32>
    %39 = tpu.matmul %38, %2, %cst_27 {dimension_numbers = #tpu.dot_dimension_numbers<[1], [0], [0], [1], [0, 0, 1, 1], [], []>} : vector<8x128xf32>, vector<128x128xf32>, vector<8x128xf32> -> vector<8x128xf32>
    %40 = vector.shape_cast %16 : vector<128xf32> to vector<1x128xf32>
    %41 = vector.broadcast %40 : vector<1x128xf32> to vector<8x128xf32>
    %42 = arith.addf %39, %41 : vector<8x128xf32>
    %cst_28 = arith.constant dense<0.000000e+00> : vector<8x128xf32>
    %43 = tpu.matmul %42, %4, %cst_28 {dimension_numbers = #tpu.dot_dimension_numbers<[1], [0], [0], [1], [0, 0, 1, 1], [], []>} : vector<8x128xf32>, vector<128x128xf32>, vector<8x128xf32> -> vector<8x128xf32>
    %44 = vector.shape_cast %18 : vector<128xf32> to vector<1x128xf32>
    %45 = vector.broadcast %44 : vector<1x128xf32> to vector<8x128xf32>
    %46 = arith.addf %43, %45 : vector<8x128xf32>
    %47 = vector.shape_cast %46 : vector<8x128xf32> to vector<1x8x128xf32>
    %cst_29 = arith.constant 0.000000e+00 : f32
    %48 = vector.broadcast %cst_29 : f32 to vector<1x16x128xf32>
    %49 = vector.extract_strided_slice %0 {offsets = [0, 0, 0], sizes = [1, 16, 1], strides = [1, 1, 1]} : vector<1x16x8xf32> to vector<1x16x1xf32>
    %50 = vector.shape_cast %49 : vector<1x16x1xf32> to vector<1x16xf32>
    %51 = vector.shape_cast %50 : vector<1x16xf32> to vector<1x16x1xf32>
    %52 = vector.extract_strided_slice %47 {offsets = [0, 0, 0], sizes = [1, 1, 128], strides = [1, 1, 1]} : vector<1x8x128xf32> to vector<1x1x128xf32>
    %53 = vector.shape_cast %52 : vector<1x1x128xf32> to vector<1x128xf32>
    %54 = vector.shape_cast %53 : vector<1x128xf32> to vector<1x1x128xf32>
    %55 = vector.shape_cast %20 : vector<128xf32> to vector<1x1x128xf32>
    %56 = vector.broadcast %51 : vector<1x16x1xf32> to vector<1x16x128xf32>
    %57 = vector.broadcast %55 : vector<1x1x128xf32> to vector<1x16x128xf32>
    %58 = arith.mulf %56, %57 : vector<1x16x128xf32>
    %59 = vector.broadcast %54 : vector<1x1x128xf32> to vector<1x16x128xf32>
    %60 = arith.addf %59, %58 : vector<1x16x128xf32>
    %cst_30 = arith.constant 0.000000e+00 : f32
    %61 = vector.broadcast %cst_30 : f32 to vector<1x16x128xf32>
    %62 = arith.maximumf %60, %61 : vector<1x16x128xf32>
    %63 = arith.addf %48, %62 : vector<1x16x128xf32>
    %64 = vector.extract_strided_slice %0 {offsets = [0, 0, 1], sizes = [1, 16, 1], strides = [1, 1, 1]} : vector<1x16x8xf32> to vector<1x16x1xf32>
    %65 = vector.shape_cast %64 : vector<1x16x1xf32> to vector<1x16xf32>
    %66 = vector.shape_cast %65 : vector<1x16xf32> to vector<1x16x1xf32>
    %67 = vector.extract_strided_slice %47 {offsets = [0, 1, 0], sizes = [1, 1, 128], strides = [1, 1, 1]} : vector<1x8x128xf32> to vector<1x1x128xf32>
    %68 = vector.shape_cast %67 : vector<1x1x128xf32> to vector<1x128xf32>
    %69 = vector.shape_cast %68 : vector<1x128xf32> to vector<1x1x128xf32>
    %70 = vector.shape_cast %20 : vector<128xf32> to vector<1x1x128xf32>
    %71 = vector.broadcast %66 : vector<1x16x1xf32> to vector<1x16x128xf32>
    %72 = vector.broadcast %70 : vector<1x1x128xf32> to vector<1x16x128xf32>
    %73 = arith.mulf %71, %72 : vector<1x16x128xf32>
    %74 = vector.broadcast %69 : vector<1x1x128xf32> to vector<1x16x128xf32>
    %75 = arith.addf %74, %73 : vector<1x16x128xf32>
    %cst_31 = arith.constant 0.000000e+00 : f32
    %76 = vector.broadcast %cst_31 : f32 to vector<1x16x128xf32>
    %77 = arith.maximumf %75, %76 : vector<1x16x128xf32>
    %78 = arith.addf %63, %77 : vector<1x16x128xf32>
    %79 = vector.extract_strided_slice %0 {offsets = [0, 0, 2], sizes = [1, 16, 1], strides = [1, 1, 1]} : vector<1x16x8xf32> to vector<1x16x1xf32>
    %80 = vector.shape_cast %79 : vector<1x16x1xf32> to vector<1x16xf32>
    %81 = vector.shape_cast %80 : vector<1x16xf32> to vector<1x16x1xf32>
    %82 = vector.extract_strided_slice %47 {offsets = [0, 2, 0], sizes = [1, 1, 128], strides = [1, 1, 1]} : vector<1x8x128xf32> to vector<1x1x128xf32>
    %83 = vector.shape_cast %82 : vector<1x1x128xf32> to vector<1x128xf32>
    %84 = vector.shape_cast %83 : vector<1x128xf32> to vector<1x1x128xf32>
    %85 = vector.shape_cast %20 : vector<128xf32> to vector<1x1x128xf32>
    %86 = vector.broadcast %81 : vector<1x16x1xf32> to vector<1x16x128xf32>
    %87 = vector.broadcast %85 : vector<1x1x128xf32> to vector<1x16x128xf32>
    %88 = arith.mulf %86, %87 : vector<1x16x128xf32>
    %89 = vector.broadcast %84 : vector<1x1x128xf32> to vector<1x16x128xf32>
    %90 = arith.addf %89, %88 : vector<1x16x128xf32>
    %cst_32 = arith.constant 0.000000e+00 : f32
    %91 = vector.broadcast %cst_32 : f32 to vector<1x16x128xf32>
    %92 = arith.maximumf %90, %91 : vector<1x16x128xf32>
    %93 = arith.addf %78, %92 : vector<1x16x128xf32>
    %94 = vector.extract_strided_slice %0 {offsets = [0, 0, 3], sizes = [1, 16, 1], strides = [1, 1, 1]} : vector<1x16x8xf32> to vector<1x16x1xf32>
    %95 = vector.shape_cast %94 : vector<1x16x1xf32> to vector<1x16xf32>
    %96 = vector.shape_cast %95 : vector<1x16xf32> to vector<1x16x1xf32>
    %97 = vector.extract_strided_slice %47 {offsets = [0, 3, 0], sizes = [1, 1, 128], strides = [1, 1, 1]} : vector<1x8x128xf32> to vector<1x1x128xf32>
    %98 = vector.shape_cast %97 : vector<1x1x128xf32> to vector<1x128xf32>
    %99 = vector.shape_cast %98 : vector<1x128xf32> to vector<1x1x128xf32>
    %100 = vector.shape_cast %20 : vector<128xf32> to vector<1x1x128xf32>
    %101 = vector.broadcast %96 : vector<1x16x1xf32> to vector<1x16x128xf32>
    %102 = vector.broadcast %100 : vector<1x1x128xf32> to vector<1x16x128xf32>
    %103 = arith.mulf %101, %102 : vector<1x16x128xf32>
    %104 = vector.broadcast %99 : vector<1x1x128xf32> to vector<1x16x128xf32>
    %105 = arith.addf %104, %103 : vector<1x16x128xf32>
    %cst_33 = arith.constant 0.000000e+00 : f32
    %106 = vector.broadcast %cst_33 : f32 to vector<1x16x128xf32>
    %107 = arith.maximumf %105, %106 : vector<1x16x128xf32>
    %108 = arith.addf %93, %107 : vector<1x16x128xf32>
    %109 = vector.extract_strided_slice %0 {offsets = [0, 0, 4], sizes = [1, 16, 1], strides = [1, 1, 1]} : vector<1x16x8xf32> to vector<1x16x1xf32>
    %110 = vector.shape_cast %109 : vector<1x16x1xf32> to vector<1x16xf32>
    %111 = vector.shape_cast %110 : vector<1x16xf32> to vector<1x16x1xf32>
    %112 = vector.extract_strided_slice %47 {offsets = [0, 4, 0], sizes = [1, 1, 128], strides = [1, 1, 1]} : vector<1x8x128xf32> to vector<1x1x128xf32>
    %113 = vector.shape_cast %112 : vector<1x1x128xf32> to vector<1x128xf32>
    %114 = vector.shape_cast %113 : vector<1x128xf32> to vector<1x1x128xf32>
    %115 = vector.shape_cast %20 : vector<128xf32> to vector<1x1x128xf32>
    %116 = vector.broadcast %111 : vector<1x16x1xf32> to vector<1x16x128xf32>
    %117 = vector.broadcast %115 : vector<1x1x128xf32> to vector<1x16x128xf32>
    %118 = arith.mulf %116, %117 : vector<1x16x128xf32>
    %119 = vector.broadcast %114 : vector<1x1x128xf32> to vector<1x16x128xf32>
    %120 = arith.addf %119, %118 : vector<1x16x128xf32>
    %cst_34 = arith.constant 0.000000e+00 : f32
    %121 = vector.broadcast %cst_34 : f32 to vector<1x16x128xf32>
    %122 = arith.maximumf %120, %121 : vector<1x16x128xf32>
    %123 = arith.addf %108, %122 : vector<1x16x128xf32>
    %124 = vector.extract_strided_slice %0 {offsets = [0, 0, 5], sizes = [1, 16, 1], strides = [1, 1, 1]} : vector<1x16x8xf32> to vector<1x16x1xf32>
    %125 = vector.shape_cast %124 : vector<1x16x1xf32> to vector<1x16xf32>
    %126 = vector.shape_cast %125 : vector<1x16xf32> to vector<1x16x1xf32>
    %127 = vector.extract_strided_slice %47 {offsets = [0, 5, 0], sizes = [1, 1, 128], strides = [1, 1, 1]} : vector<1x8x128xf32> to vector<1x1x128xf32>
    %128 = vector.shape_cast %127 : vector<1x1x128xf32> to vector<1x128xf32>
    %129 = vector.shape_cast %128 : vector<1x128xf32> to vector<1x1x128xf32>
    %130 = vector.shape_cast %20 : vector<128xf32> to vector<1x1x128xf32>
    %131 = vector.broadcast %126 : vector<1x16x1xf32> to vector<1x16x128xf32>
    %132 = vector.broadcast %130 : vector<1x1x128xf32> to vector<1x16x128xf32>
    %133 = arith.mulf %131, %132 : vector<1x16x128xf32>
    %134 = vector.broadcast %129 : vector<1x1x128xf32> to vector<1x16x128xf32>
    %135 = arith.addf %134, %133 : vector<1x16x128xf32>
    %cst_35 = arith.constant 0.000000e+00 : f32
    %136 = vector.broadcast %cst_35 : f32 to vector<1x16x128xf32>
    %137 = arith.maximumf %135, %136 : vector<1x16x128xf32>
    %138 = arith.addf %123, %137 : vector<1x16x128xf32>
    %139 = vector.extract_strided_slice %0 {offsets = [0, 0, 6], sizes = [1, 16, 1], strides = [1, 1, 1]} : vector<1x16x8xf32> to vector<1x16x1xf32>
    %140 = vector.shape_cast %139 : vector<1x16x1xf32> to vector<1x16xf32>
    %141 = vector.shape_cast %140 : vector<1x16xf32> to vector<1x16x1xf32>
    %142 = vector.extract_strided_slice %47 {offsets = [0, 6, 0], sizes = [1, 1, 128], strides = [1, 1, 1]} : vector<1x8x128xf32> to vector<1x1x128xf32>
    %143 = vector.shape_cast %142 : vector<1x1x128xf32> to vector<1x128xf32>
    %144 = vector.shape_cast %143 : vector<1x128xf32> to vector<1x1x128xf32>
    %145 = vector.shape_cast %20 : vector<128xf32> to vector<1x1x128xf32>
    %146 = vector.broadcast %141 : vector<1x16x1xf32> to vector<1x16x128xf32>
    %147 = vector.broadcast %145 : vector<1x1x128xf32> to vector<1x16x128xf32>
    %148 = arith.mulf %146, %147 : vector<1x16x128xf32>
    %149 = vector.broadcast %144 : vector<1x1x128xf32> to vector<1x16x128xf32>
    %150 = arith.addf %149, %148 : vector<1x16x128xf32>
    %cst_36 = arith.constant 0.000000e+00 : f32
    %151 = vector.broadcast %cst_36 : f32 to vector<1x16x128xf32>
    %152 = arith.maximumf %150, %151 : vector<1x16x128xf32>
    %153 = arith.addf %138, %152 : vector<1x16x128xf32>
    %154 = vector.extract_strided_slice %0 {offsets = [0, 0, 7], sizes = [1, 16, 1], strides = [1, 1, 1]} : vector<1x16x8xf32> to vector<1x16x1xf32>
    %155 = vector.shape_cast %154 : vector<1x16x1xf32> to vector<1x16xf32>
    %156 = vector.shape_cast %155 : vector<1x16xf32> to vector<1x16x1xf32>
    %157 = vector.extract_strided_slice %47 {offsets = [0, 7, 0], sizes = [1, 1, 128], strides = [1, 1, 1]} : vector<1x8x128xf32> to vector<1x1x128xf32>
    %158 = vector.shape_cast %157 : vector<1x1x128xf32> to vector<1x128xf32>
    %159 = vector.shape_cast %158 : vector<1x128xf32> to vector<1x1x128xf32>
    %160 = vector.shape_cast %20 : vector<128xf32> to vector<1x1x128xf32>
    %161 = vector.broadcast %156 : vector<1x16x1xf32> to vector<1x16x128xf32>
    %162 = vector.broadcast %160 : vector<1x1x128xf32> to vector<1x16x128xf32>
    %163 = arith.mulf %161, %162 : vector<1x16x128xf32>
    %164 = vector.broadcast %159 : vector<1x1x128xf32> to vector<1x16x128xf32>
    %165 = arith.addf %164, %163 : vector<1x16x128xf32>
    %cst_37 = arith.constant 0.000000e+00 : f32
    %166 = vector.broadcast %cst_37 : f32 to vector<1x16x128xf32>
    %167 = arith.maximumf %165, %166 : vector<1x16x128xf32>
    %168 = arith.addf %153, %167 : vector<1x16x128xf32>
    %169 = vector.shape_cast %168 : vector<1x16x128xf32> to vector<16x128xf32>
    %cst_38 = arith.constant dense<0.000000e+00> : vector<16x128xf32>
    %170 = tpu.matmul %169, %6, %cst_38 {dimension_numbers = #tpu.dot_dimension_numbers<[1], [0], [0], [1], [0, 0, 1, 1], [], []>} : vector<16x128xf32>, vector<128x128xf32>, vector<16x128xf32> -> vector<16x128xf32>
    %cst_39 = arith.constant 8.000000e+00 : f32
    %171 = vector.broadcast %cst_39 : f32 to vector<128xf32>
    %172 = arith.mulf %171, %22 : vector<128xf32>
    %173 = vector.shape_cast %172 : vector<128xf32> to vector<1x128xf32>
    %174 = vector.broadcast %173 : vector<1x128xf32> to vector<16x128xf32>
    %175 = arith.addf %170, %174 : vector<16x128xf32>
    %cst_40 = arith.constant dense<0.000000e+00> : vector<16x128xf32>
    %176 = tpu.matmul %175, %8, %cst_40 {dimension_numbers = #tpu.dot_dimension_numbers<[1], [0], [0], [1], [0, 0, 1, 1], [], []>} : vector<16x128xf32>, vector<128x128xf32>, vector<16x128xf32> -> vector<16x128xf32>
    %177 = vector.shape_cast %24 : vector<128xf32> to vector<1x128xf32>
    %178 = vector.broadcast %177 : vector<1x128xf32> to vector<16x128xf32>
    %179 = arith.addf %176, %178 : vector<16x128xf32>
    %cst_41 = arith.constant 0.000000e+00 : f32
    %180 = vector.broadcast %cst_41 : f32 to vector<16x128xf32>
    %181 = arith.maximumf %179, %180 : vector<16x128xf32>
    %cst_42 = arith.constant dense<0.000000e+00> : vector<16x128xf32>
    %182 = tpu.matmul %181, %10, %cst_42 {dimension_numbers = #tpu.dot_dimension_numbers<[1], [0], [0], [1], [0, 0, 1, 1], [], []>} : vector<16x128xf32>, vector<128x128xf32>, vector<16x128xf32> -> vector<16x128xf32>
    %183 = vector.shape_cast %26 : vector<128xf32> to vector<1x128xf32>
    %184 = vector.broadcast %183 : vector<1x128xf32> to vector<16x128xf32>
    %185 = arith.addf %182, %184 : vector<16x128xf32>
    %186 = vector.shape_cast %185 : vector<16x128xf32> to vector<1x16x128xf32>
    %c0_43 = arith.constant 0 : index
    %c0_44 = arith.constant 0 : index
    %c0_45 = arith.constant 0 : index
    %187 = vector.load %arg4[%c0_43, %c0_44, %c0_45] : memref<1x16x128xf32, #tpu.memory_space<vmem>>, vector<1x16x128xf32>
    tpu.vector_store %arg4[%c0_43, %c0_44, %c0_45], %186 {strides = array<i32>} : memref<1x16x128xf32, #tpu.memory_space<vmem>>, vector<1x16x128xf32>,
    return
  }
  func.func @transform_0(%arg0: i32) -> (i32, i32, i32) {
    %c0_i32 = arith.constant 0 : i32
    %c0_i32_0 = arith.constant 0 : i32
    %c0_i32_1 = arith.constant 0 : i32
    return %arg0, %c0_i32, %c0_i32_0 : i32, i32, i32
  }
  func.func @transform_1(%arg0: i32) -> (i32, i32, i32) {
    %c0_i32 = arith.constant 0 : i32
    %c0_i32_0 = arith.constant 0 : i32
    %c0_i32_1 = arith.constant 0 : i32
    %c0_i32_2 = arith.constant 0 : i32
    return %c0_i32, %c0_i32_0, %c0_i32_1 : i32, i32, i32
  }
  func.func @transform_2(%arg0: i32) -> (i32, i32) {
    %c0_i32 = arith.constant 0 : i32
    %c0_i32_0 = arith.constant 0 : i32
    %c0_i32_1 = arith.constant 0 : i32
    return %c0_i32, %c0_i32_0 : i32, i32
  }
  func.func @transform_3(%arg0: i32) -> (i32, i32, i32) {
    %c0_i32 = arith.constant 0 : i32
    %c0_i32_0 = arith.constant 0 : i32
    %c0_i32_1 = arith.constant 0 : i32
    return %arg0, %c0_i32, %c0_i32_0 : i32, i32, i32
  }
}

</mosaic_0001>

<bundles_post_ra>
// kernel: tpu_custom_call.1
= control target key start
LH: loop header
LB: loop body
LE: loop exit
PB: predicated region body
PF: predicated region fallthrough
CT: control target
= control target key end

     0   :  { %8 = vsyncpa [#allocation3], 0  ;;  %s1671_s0 = inlined_call_operand.vmem [shape: f32[2,16,8], index: 0, kind: input, shape index: {}]   ;;  %s1672_s1 = inlined_call_operand.hbm [shape: f32[5,128,128], index: 1, kind: input, shape index: {}]   ;;  %s1673_s2 = inlined_call_operand.vmem [shape: f32[8,128], index: 2, kind: input, shape index: {}]   ;;  %s1674_s3 = inlined_call_operand.hbm [shape: f32[2,16,128], index: 3, kind: output, shape index: {}]  }
   0x1   :  { %9 = vsyncpa [#allocation4], 0 }
   0x2   :  { %11 = vsyncpa [#allocation4 + $0x1], 0  ;;  %s1439_s12 = smov 0   ;;  %s1441_s13 = smov 0  }
   0x3   :  { %s1443_s14 = smov 0   ;;  %s1445_s15 = smov 0  }
   0x4 LB: > { %s1460_s16 = sadd.s32 4294967295, %s1401_s15   ;;  %s946_s17 = sadd.s32 4294967294, %s1401_s15   ;;  %s1401_s15 = sphi %s1445_s15, %s1682_s15   ;;  %s1397_s14 = sphi %s1443_s14, %s1681_s14   ;;  %s1393_s13 = sphi %s1441_s13, %s1680_s13   ;;  %s1389_s12 = sphi %s1439_s12, %s1679_s12  }
   0x5   : > { %s1464_s18 = sadd.s32 1, %s1401_s15   ;;  %s92_s19 = sadd.s32 1, %s1397_s14 }
   0x6   : > { %s89_s20 = ssub.s32 %s1401_s15, %s1464_s18  ;;  %p102_p0 = scmp.ne.s32.totalorder %s1397_s14, %s1393_s13 }
   0x7   : > { %p90_p1 = scmp.eq.s32.totalorder %s89_s20, 0  ;;  %p103_p2 = scmp.eq.s32.totalorder %s1460_s16, 1 }
   0x8   : > { %p108_p3 = scmp.ne.s32.totalorder %s1393_s13, %s1389_s12  ;;  %p109_p4 = scmp.eq.s32.totalorder %s946_s17, 1 }
   0x9   : > { %s1475_s21 = scalar_select %p90_p1, %s1397_s14, %s92_s19  }
   0xa   : > { %p1477_p5 = por %p103_p2, %p102_p0  ;;  %p1481_p6 = por %p109_p4, %p108_p3 }
   0xb   : > { %p947_p7 = scmp.ge.s32.totalorder %s1401_s15, 1  ;;  %p116_p8 = scmp.lt.s32.totalorder %s1401_s15, 3 }
   0xc   : > { %s1676_s23 = scalar_select %p1481_p6, 1, 0 }
   0xd   : > { %p1246_p9 = scmp.eq.s32.totalorder %s1460_s16, 0  ;;  %p1488_p10 = pnand %p947_p7, %p116_p8 }
   0xe   : > { %s1403_s25 = smov [#allocation2]  }
   0xf   : > { %s128_s26 = sshll.u32 %s1403_s25, 4  ;;  %p1238_p11 = pneg %p1488_p10  ;;  %s129_s26 = int_to_ptr.vmem [resolvable:$true] %s128_s26 }
  0x10   : > { %s1322_s27 = scalar_lea.vmem %s129_s26, 10240  ;;  %p1330_p3 = scmp.lt.s32.totalorder %s129_s26, %s129_s26 }
  0x11   : > { %p1239_p12 = pnand %p1246_p9, %p1238_p11  ;;  %p1323_p0 = scmp.ne.s32.totalorder %s129_s26, %s1322_s27 }
  0x12   : > { %p1331_p4 = scmp.lt.s32.totalorder %s1322_s27, %s1322_s27 }
  0x13   : > { %p1313_p13 = pneg %p1239_p12 }
  0x14   : > { %p1332_p6 = por %p1331_p4, %p1330_p3 }
  0x15   : > { %p1325_p1 = pnand %p1323_p0, %p1313_p13 }
  0x17   : > { %p1326_p2 = pneg %p1325_p1 }
  0x19   : > { %p1333_p7 = pnand %p1332_p6, %p1326_p2 }
  0x1b   : > { %1336 = shalt.err (!%p1333_p7)
}
  0x1c   : > { %s1404_s28 = smov 128   ;;  %s1405_s29 = smov 8  }
  0x1d   : > { %1241 = dma.hbm_to_vmem [thread:$0]  (!%p1239_p12), %s1672_s1, 10240, %s129_s26, [#allocation3], %s1404_s28, %s1404_s28, %s1405_s29  }
  0x1e   : > { %155 = sbr.rel (%p1488_p10) target bundleno = 1200 (0x4b0), region = 32 }
  0x23   : > { %1380 = dma.done.wait (%p1246_p9), [#allocation3], 10240  }
  0x24   : > { %1382 = vsyncadd (%p1246_p9), [#allocation3], 4294957056  ;;  %p179_p8 = scmp.lt.s32.totalorder %s1460_s16, 1  ;;  %v1406_v0 = vmov 0.0   ;;  %vm278_vm0 = vcmask 64512   ;;  %v201_v3 = vld [vmem:[#allocation2 + $0x78] sm:$0xff] }
  0x25   : > { %1057 = vmatprep.subr.mxu0 %v1406_v0  ;;  %1092 = vmatprep.subr.mxu1 %v1406_v0  ;;  %v200_v6 = vld [vmem:[#allocation2 + $0x70] sm:$0xff]  ;;  %v199_v8 = vld [vmem:[#allocation2 + $0x68] sm:$0xff]  ;;  %v198_v10 = vld [vmem:[#allocation2 + $0x60] sm:$0xff]  ;;  %vm1407_vm1 = vmmov 0   ;;  %v1408_v50 = vmov 1   ;;  %v1409_v51 = vmov 0  }
  0x26   : > { %s180_s5 = scalar_select %p179_p8, %s1460_s16, 1  ;;  %1058 = vmatpush3.msra.mxu0 %v201_v3  ;;  %v197_v12 = vld [vmem:[#allocation2 + $0x58] sm:$0xff]  ;;  %v196_v14 = vld [vmem:[#allocation2 + $0x50] sm:$0xff]  ;;  %1089 = vmatprep.mubr.msk.f32.mxu0 %vm1407_vm1, %v1406_v0  ;;  %v195_v18 = vld [vmem:[#allocation2 + $0x48] sm:$0xff]  ;;  %v1410_v52 = vmov 2   ;;  %v1411_v53 = vmov 3  }
  0x27   : > { %1059 = vmatprep.subr.mxu0 %v1406_v0  ;;  %v218_v15 = vld [vmem:[#allocation2 + $0xf8] sm:$0xff]  ;;  %v217_v16 = vld [vmem:[#allocation2 + $0xf0] sm:$0xff]  ;;  %1124 = vmatprep.mubr.msk.f32.mxu1 %vm1407_vm1, %v1406_v0  ;;  %v216_v19 = vld [vmem:[#allocation2 + $0xe8] sm:$0xff]  ;;  %v1412_v54 = vmov 5   ;;  %v1413_v55 = vmov 6   ;;  %v1414_v56 = vmov 4  }
  0x28   : > { %s967_s6 = sshll.u32 %s180_s5, 4  ;;  %1060 = vmatpush3.msra.mxu0 %v200_v6  ;;  %1093 = vmatpush3.msra.mxu1 %v218_v15  ;;  %v194_v21 = vld [vmem:[#allocation2 + $0x40] sm:$0xff]  ;;  %v193_v23 = vld [vmem:[#allocation2 + $0x38] sm:$0xff]  ;;  %v192_v25 = vld [vmem:[#allocation2 + $0x30] sm:$0xff]  ;;  %v1415_v57 = vmov 7   ;;  %s968_s17 = sshll.u32 %s1460_s16, 8 }
  0x29   : > { %s183_s9 = scalar_lea.vmem %s1671_s0, %s967_s6  ;;  %1061 = vmatprep.subr.mxu0 %v1406_v0  ;;  %1094 = vmatprep.subr.mxu1 %v1406_v0  ;;  %v215_v24 = vld [vmem:[#allocation2 + $0xe0] sm:$0xff]  ;;  %v214_v26 = vld [vmem:[#allocation2 + $0xd8] sm:$0xff]  ;;  %v191_v27 = vld [vmem:[#allocation2 + $0x28] sm:$0xff]  ;;  %s176_s6 = sand.u32 1, %s1393_s13  }
  0x2a   : > { %v1512_v1 = vld [vmem:[%s183_s9] sm:$0xff]  ;;  %v1514_v2 = vld [vmem:[%s183_s9 + $0x8] sm:$0xff]  ;;  %1062 = vmatpush3.msra.mxu0 %v199_v8  ;;  %1095 = vmatpush3.msra.mxu1 %v217_v16  ;;  %v213_v28 = vld [vmem:[#allocation2 + $0xd0] sm:$0xff]  ;;  %s952_s7 = sshll.u32 %s176_s6, 4  ;;  %s1629_s24 = scalar_lea.hbm %s1674_s3, %s968_s17 }
  0x2b   : > { %v279_v4 = vsel %vm278_vm0, %v1512_v1, 0.0  ;;  %v280_v5 = vsel %vm278_vm0, %v1514_v2, 0.0  ;;  %1063 = vmatprep.subr.mxu0 %v1406_v0  ;;  %1096 = vmatprep.subr.mxu1 %v1406_v0  ;;  %v190_v29 = vld [vmem:[#allocation2 + $0x20] sm:$0xff]  ;;  %v212_v30 = vld [vmem:[#allocation2 + $0xc8] sm:$0xff]  ;;  %v189_v31 = vld [vmem:[#allocation2 + $0x18] sm:$0xff]  ;;  %s178_s10 = scalar_lea.vmem [#allocation5], %s952_s7 }
  0x2c   : > { %v281_v7 = vadd.f32 %v280_v5, %v279_v4  ;;  %1064 = vmatpush3.msra.mxu0 %v198_v10  ;;  %1097 = vmatpush3.msra.mxu1 %v216_v19  ;;  %v211_v32 = vld [vmem:[#allocation2 + $0xc0] sm:$0xff]  ;;  %v188_v33 = vld [vmem:[#allocation2 + $0x10] sm:$0xff]  ;;  %v210_v34 = vld [vmem:[#allocation2 + $0xb8] sm:$0xff]  ;;  %s872_s11 = sshll.u32 %s178_s10, 4  ;;  %s1631_s25 = scalar_lea.sflag [#allocation4], %s176_s6  ;;  %s1624_s11 = int_to_ptr.vmem [resolvable:$true] %s872_s11 }
  0x2d   : > { %1065 = vmatprep.subr.mxu0 %v1406_v0  ;;  %1098 = vmatprep.subr.mxu1 %v1406_v0  ;;  %v187_v35 = vld [vmem:[#allocation2 + $0x8] sm:$0xff]  ;;  %v209_v36 = vld [vmem:[#allocation2 + $0xb0] sm:$0xff]  ;;  %v186_v37 = vld [vmem:[#allocation2] sm:$0xff]  ;;  %s1337_s26 = scalar_lea.vmem %s1624_s11, 256  ;;  %s1416_s16 = smov [#allocation5]  }
  0x2e   : > { %v282_v9 = vrot.slane %v281_v7, 4  ;;  %1066 = vmatpush3.msra.mxu0 %v197_v12  ;;  %1099 = vmatpush3.msra.mxu1 %v215_v24  ;;  %v208_v38 = vld [vmem:[#allocation2 + $0xa8] sm:$0xff]  ;;  %v207_v39 = vld [vmem:[#allocation2 + $0xa0] sm:$0xff]  ;;  %v206_v40 = vld [vmem:[#allocation2 + $0x98] sm:$0xff]  ;;  %p1338_p6 = scmp.ne.s32.totalorder %s1624_s11, %s1337_s26  ;;  %s1341_s27 = sshll.u32 %s1416_s16, 4  ;;  %s1342_s27 = int_to_ptr.vmem [resolvable:$false] %s1341_s27 }
  0x2f   : > { %1067 = vmatprep.subr.mxu0 %v1406_v0  ;;  %1100 = vmatprep.subr.mxu1 %v1406_v0  ;;  %v205_v41 = vld [vmem:[#allocation2 + $0x90] sm:$0xff]  ;;  %v955_v42 = vld [vmem:[%s1673_s2] ss:$0 sm:$0xff]  ;;  %v956_v43 = vld [vmem:[%s1673_s2 + $0x1] ss:$0 sm:$0xff]  ;;  %s1343_s28 = scalar_lea.vmem %s1342_s27, 512  ;;  %p1344_p11 = scmp.lt.s32.totalorder %s1624_s11, %s1342_s27 }
  0x30   : > { %v283_v11 = vadd.f32 %v282_v9, %v281_v7  ;;  %1068 = vmatpush3.msra.mxu0 %v196_v14  ;;  %1101 = vmatpush3.msra.mxu1 %v214_v26  ;;  %v204_v48 = vld [vmem:[#allocation2 + $0x88] sm:$0xff]  ;;  %v203_v49 = vld [vmem:[#allocation2 + $0x80] sm:$0xff]  ;;  %v235_v58 = vld [vmem:[#allocation2 + $0x178] sm:$0xff]  ;;  %p1339_p9 = pnand %p1338_p6, %p1477_p5  ;;  %p1345_p12 = scmp.lt.s32.totalorder %s1343_s28, %s1337_s26 }
  0x31   : > { %1069 = vmatprep.subr.mxu0 %v1406_v0  ;;  %1102 = vmatprep.subr.mxu1 %v1406_v0  ;;  %v234_v59 = vld [vmem:[#allocation2 + $0x170] sm:$0xff]  ;;  %v233_v60 = vld [vmem:[#allocation2 + $0x168] sm:$0xff]  ;;  %v232_v61 = vld [vmem:[#allocation2 + $0x160] sm:$0xff] }
  0x32   : > { %v284_v13 = vrot.slane %v283_v11, 2  ;;  %1070 = vmatpush3.msra.mxu0 %v195_v18  ;;  %1103 = vmatpush3.msra.mxu1 %v213_v28  ;;  %v957_v62 = vld [vmem:[%s1673_s2 + $0x2] ss:$0 sm:$0xff]  ;;  %v231_v4 = vld [vmem:[#allocation2 + $0x158] sm:$0xff]  ;;  %v230_v5 = vld [vmem:[#allocation2 + $0x150] sm:$0xff]  ;;  %p1340_p10 = pneg %p1339_p9  ;;  %p1346_p13 = por %p1345_p12, %p1344_p11 }
  0x33   : > { %1071 = vmatprep.subr.mxu0 %v1406_v0  ;;  %1104 = vmatprep.subr.mxu1 %v1406_v0  ;;  %v229_v6 = vld [vmem:[#allocation2 + $0x148] sm:$0xff]  ;;  %v226_v7 = vld [vmem:[#allocation2 + $0x130] sm:$0xff]  ;;  %v224_v9 = vld [vmem:[#allocation2 + $0x120] sm:$0xff] }
  0x34   : > { %v285_v17 = vadd.f32 %v284_v13, %v283_v11  ;;  %1072 = vmatpush3.msra.mxu0 %v194_v21  ;;  %1105 = vmatpush3.msra.mxu1 %v212_v30  ;;  %v225_v8 = vld [vmem:[#allocation2 + $0x128] sm:$0xff]  ;;  %v223_v10 = vld [vmem:[#allocation2 + $0x118] sm:$0xff]  ;;  %v222_v11 = vld [vmem:[#allocation2 + $0x110] sm:$0xff]  ;;  %p1347_p0 = pnand %p1346_p13, %p1340_p10 }
  0x35   : > { %1073 = vmatprep.subr.mxu0 %v1406_v0  ;;  %1106 = vmatprep.subr.mxu1 %v1406_v0  ;;  %v221_v12 = vld [vmem:[#allocation2 + $0x108] sm:$0xff]  ;;  %v220_v13 = vld [vmem:[#allocation2 + $0x100] sm:$0xff]  ;;  %v252_v14 = vld [vmem:[#allocation2 + $0x1f8] sm:$0xff] }
  0x36   : > { %v286_v20 = vrot.slane %v285_v17, 1  ;;  %1074 = vmatpush3.msra.mxu0 %v193_v23  ;;  %1107 = vmatpush3.msra.mxu1 %v211_v32  ;;  %v251_v15 = vld [vmem:[#allocation2 + $0x1f0] sm:$0xff]  ;;  %v250_v16 = vld [vmem:[#allocation2 + $0x1e8] sm:$0xff]  ;;  %v248_v18 = vld [vmem:[#allocation2 + $0x1d8] sm:$0xff] }
  0x37   : > { %1075 = vmatprep.subr.mxu0 %v1406_v0  ;;  %1108 = vmatprep.subr.mxu1 %v1406_v0  ;;  %v247_v19 = vld [vmem:[#allocation2 + $0x1d0] sm:$0xff]  ;;  %v245_v21 = vld [vmem:[#allocation2 + $0x1c0] sm:$0xff]  ;;  %v242_v24 = vld [vmem:[#allocation2 + $0x1a8] sm:$0xff] }
  0x38   : > { %v287_v22 = vadd.f32 %v286_v20, %v285_v17  ;;  %1076 = vmatpush3.msra.mxu0 %v192_v25  ;;  %1109 = vmatpush3.msra.mxu1 %v210_v34  ;;  %v249_v17 = vld [vmem:[#allocation2 + $0x1e0] sm:$0xff]  ;;  %v246_v20 = vld [vmem:[#allocation2 + $0x1c8] sm:$0xff]  ;;  %v243_v23 = vld [vmem:[#allocation2 + $0x1b0] sm:$0xff] }
  0x39   : > { %1077 = vmatprep.subr.mxu0 %v1406_v0  ;;  %1110 = vmatprep.subr.mxu1 %v1406_v0  ;;  %v241_v25 = vld [vmem:[#allocation2 + $0x1a0] sm:$0xff]  ;;  %v240_v26 = vld [vmem:[#allocation2 + $0x198] sm:$0xff] }
  0x3a   : > { %289 = vbcast.lane.b32.xlu0 %v287_v22, 256  ;;  %1078 = vmatpush3.msra.mxu0 %v191_v27  ;;  %v244_v22 = vld [vmem:[#allocation2 + $0x1b8] sm:$0xff] }
  0x3b   : > { %1079 = vmatprep.subr.mxu0 %v1406_v0  ;;  %1111 = vmatpush3.msra.mxu1 %v209_v36  ;;  %v466_v36 = vlaneseq }
  0x3c   : > { %1080 = vmatpush3.msra.mxu0 %v190_v29  ;;  %1112 = vmatprep.subr.mxu1 %v1406_v0 }
  0x3d   : > { %1081 = vmatprep.subr.mxu0 %v1406_v0  ;;  %1113 = vmatpush3.msra.mxu1 %v208_v38 }
  0x3e   : > { %1082 = vmatpush3.msra.mxu0 %v189_v31  ;;  %1114 = vmatprep.subr.mxu1 %v1406_v0 }
  0x3f   : > { %1083 = vmatprep.subr.mxu0 %v1406_v0  ;;  %1115 = vmatpush3.msra.mxu1 %v207_v39  ;;  %v1575_v39 = vshrl.u32 %v466_v36, 7 }
  0x40   : > { %1084 = vmatpush3.msra.mxu0 %v188_v33  ;;  %1116 = vmatprep.subr.mxu1 %v1406_v0 }
  0x41   : > { %1085 = vmatprep.subr.mxu0 %v1406_v0  ;;  %1117 = vmatpush3.msra.mxu1 %v206_v40  ;;  %v1580_v40 = vld [vmem:[%s1673_s2 + $0x4] ss:$0 sm:$0xff] }
  0x42   : > { %1086 = vmatpush3.msra.mxu0 %v187_v35  ;;  %1118 = vmatprep.subr.mxu1 %v1406_v0 }
  0x43   : > { %1087 = vmatprep.subr.mxu0 %v1406_v0  ;;  %1119 = vmatpush3.msra.mxu1 %v205_v41  ;;  %v958_v41 = vld [vmem:[%s1673_s2 + $0x3] ss:$0 sm:$0xff] }
  0x44   : > { %1088 = vmatpush3.msra.mxu0 %v186_v37  ;;  %1120 = vmatprep.subr.mxu1 %v1406_v0 }
  0x45   : > { %1121 = vmatpush3.msra.mxu1 %v204_v48  ;;  %1297 = vset.pattern.permute.xlu1 %v1408_v50  ;;  %v528_v48 = vsub.s32 3, %v1575_v39 }
  0x46   : > { %1122 = vmatprep.subr.mxu1 %v1406_v0  ;;  %1296 = vset.pattern.permute.xlu0 %v1409_v51 }
  0x47   : > { %1123 = vmatpush3.msra.mxu1 %v203_v49  ;;  %477 = vperm.xlu1 %1297, %v1512_v1   ;;  %v548_v49 = vsub.s32 4, %v1575_v39 }
  0x48   : > { %452 = vperm.xlu0 %1296, %v1512_v1   ;;  %1127 = vmatprep.subr.mxu0 %v235_v58 }
  0x49   : > { %1162 = vmatprep.subr.mxu1 %v252_v14 }
  0x4b   : > { %1298 = vset.pattern.permute.xlu1 %v1409_v51 }
  0x4c   : > { %1300 = vset.pattern.permute.xlu0 %v1410_v52  ;;  %457 = vperm.xlu1 %1298, %v1514_v2  }
  0x4d   : > { %497 = vperm.xlu0 %1300, %v1512_v1  }
  0x50   : > { %1299 = vset.pattern.permute.xlu1 %v1408_v50 }
  0x51   : > { %1303 = vset.pattern.permute.xlu0 %v1411_v53  ;;  %481 = vperm.xlu1 %1299, %v1514_v2  }
  0x52   : > { %521 = vperm.xlu0 %1303, %v1514_v2  }
  0x55   : > { %1301 = vset.pattern.permute.xlu1 %v1410_v52 }
  0x56   : > { %1305 = vset.pattern.permute.xlu0 %v1412_v54  ;;  %501 = vperm.xlu1 %1301, %v1514_v2  }
  0x57   : > { %557 = vperm.xlu0 %1305, %v1512_v1  }
  0x5a   : > { %1302 = vset.pattern.permute.xlu1 %v1411_v53 }
  0x5b   : > { %1308 = vset.pattern.permute.xlu0 %v1413_v55  ;;  %517 = vperm.xlu1 %1302, %v1512_v1  }
  0x5c   : > { %581 = vperm.xlu0 %1308, %v1514_v2  }
  0x5f   : > { %1304 = vset.pattern.permute.xlu1 %v1414_v56  ;;  %v568_v56 = vsub.s32 5, %v1575_v39 }
  0x60   : > { %1310 = vset.pattern.permute.xlu0 %v1415_v57  ;;  %537 = vperm.xlu1 %1304, %v1512_v1  }
  0x64   : > { %541 = vperm.xlu1 %1304, %v1514_v2  }
  0x68   : > { %1306 = vset.pattern.permute.xlu1 %v1412_v54 }
  0x69   : > { %561 = vperm.xlu1 %1306, %v1514_v2  }
  0x6d   : > { %1307 = vset.pattern.permute.xlu1 %v1413_v55 }
  0x6e   : > { %577 = vperm.xlu1 %1307, %v1512_v1  }
  0x72   : > { %1309 = vset.pattern.permute.xlu1 %v1415_v57 }
  0x73   : > { %597 = vperm.xlu1 %1309, %v1512_v1   ;;  %v228_v1 = vld [vmem:[#allocation2 + $0x140] sm:$0xff] }
  0x77   : > { %601 = vperm.xlu1 %1309, %v1514_v2   ;;  %v227_v2 = vld [vmem:[#allocation2 + $0x138] sm:$0xff] }
  0xac   : > { %v290_v44 = vpop.permute.xlu0 %289 }
  0xad   : > { %v295_v45 = vmul.f32 %v955_v42, %v290_v44  ;;  %v468_v44 = vsub.s32 0, %v1575_v39 }
  0xaf   : > { %v300_v46 = vadd.f32 %v956_v43, %v295_v45  ;;  %v488_v45 = vsub.s32 1, %v1575_v39 }
  0xb1   : > { %v301_v47 = vmax.f32 %v300_v46, 0.0  ;;  %v508_v46 = vsub.s32 2, %v1575_v39 }
  0xb3   : > { %1090 = vmatmul.mubr.f32.vlgmr.msra.gmra.mxu0 %v301_v47 }
  0xb4   : > { %1128 = vmatpush3.msra.mxu0 %v235_v58 }
  0xb5   : > { %1129 = vmatprep.subr.mxu0 %v234_v59 }
  0xb6   : > { %1130 = vmatpush3.msra.mxu0 %v234_v59 }
  0xb7   : > { %1131 = vmatprep.subr.mxu0 %v233_v60 }
  0xb8   : > { %1132 = vmatpush3.msra.mxu0 %v233_v60 }
  0xb9   : > { %1133 = vmatprep.subr.mxu0 %v232_v61 }
  0xba   : > { %1134 = vmatpush3.msra.mxu0 %v232_v61 }
  0xbb   : > { %1135 = vmatprep.subr.mxu0 %v231_v4 }
  0xbc   : > { %1136 = vmatpush3.msra.mxu0 %v231_v4 }
  0xbd   : > { %1137 = vmatprep.subr.mxu0 %v230_v5 }
  0xbe   : > { %1138 = vmatpush3.msra.mxu0 %v230_v5 }
  0xbf   : > { %1139 = vmatprep.subr.mxu0 %v229_v6 }
  0xc0   : > { %1140 = vmatpush3.msra.mxu0 %v229_v6 }
  0xc1   : > { %1141 = vmatprep.subr.mxu0 %v228_v1 }
  0xc2   : > { %1142 = vmatpush3.msra.mxu0 %v228_v1  ;;  %v478_v27 = vpop.permute.xlu1 %477 }
  0xc3   : > { %1143 = vmatprep.subr.mxu0 %v227_v2  ;;  %v453_v33 = vpop.permute.xlu0 %452  ;;  %v484_v50 = vmul.f32 %v1580_v40, %v478_v27 }
  0xc4   : > { %1144 = vmatpush3.msra.mxu0 %v227_v2  ;;  %v464_v61 = vmul.f32 %v1580_v40, %v453_v33 }
  0xc5   : > { %1145 = vmatprep.subr.mxu0 %v226_v7 }
  0xc6   : > { %1146 = vmatpush3.msra.mxu0 %v226_v7 }
  0xc7   : > { %1147 = vmatprep.subr.mxu0 %v225_v8  ;;  %v458_v28 = vpop.permute.xlu1 %457 }
  0xc8   : > { %1148 = vmatpush3.msra.mxu0 %v225_v8  ;;  %v498_v35 = vpop.permute.xlu0 %497  ;;  %v465_v52 = vmul.f32 %v1580_v40, %v458_v28 }
  0xc9   : > { %1149 = vmatprep.subr.mxu0 %v224_v9 }
  0xca   : > { %1150 = vmatpush3.msra.mxu0 %v224_v9 }
  0xcb   : > { %1151 = vmatprep.subr.mxu0 %v223_v10 }
  0xcc   : > { %1152 = vmatpush3.msra.mxu0 %v223_v10  ;;  %v482_v29 = vpop.permute.xlu1 %481  ;;  %v588_v10 = vsub.s32 6, %v1575_v39 }
  0xcd   : > { %1153 = vmatprep.subr.mxu0 %v222_v11  ;;  %v522_v38 = vpop.permute.xlu0 %521  ;;  %v485_v53 = vmul.f32 %v1580_v40, %v482_v29 }
  0xce   : > { %1154 = vmatpush3.msra.mxu0 %v222_v11  ;;  %v525_v54 = vmul.f32 %v1580_v40, %v522_v38 }
  0xcf   : > { %1155 = vmatprep.subr.mxu0 %v221_v12 }
  0xd0   : > { %1156 = vmatpush3.msra.mxu0 %v221_v12 }
  0xd1   : > { %1157 = vmatprep.subr.mxu0 %v220_v13  ;;  %v502_v30 = vpop.permute.xlu1 %501 }
  0xd2   : > { %1158 = vmatpush3.msra.mxu0 %v220_v13  ;;  %v558_v43 = vpop.permute.xlu0 %557  ;;  %v505_v57 = vmul.f32 %v1580_v40, %v502_v30 }
  0xd3   : > { %v564_v12 = vmul.f32 %v1580_v40, %v558_v43 }
  0xd6   : > { %v518_v31 = vpop.permute.xlu1 %517 }
  0xd7   : > { %v582_v2 = vpop.permute.xlu0 %581  ;;  %v524_v11 = vmul.f32 %v1580_v40, %v518_v31 }
  0xdb   : > { %v538_v32 = vpop.permute.xlu1 %537 }
  0xdf   : > { %v542_v34 = vpop.permute.xlu1 %541 }
  0xe4   : > { %v562_v37 = vpop.permute.xlu1 %561 }
  0xe5   : > { %v565_v7 = vmul.f32 %v1580_v40, %v562_v37 }
  0xe9   : > { %v578_v42 = vpop.permute.xlu1 %577 }
  0xee   : > { %v598_v4 = vpop.permute.xlu1 %597 }
  0xef   : > { %v604_v33 = vmul.f32 %v1580_v40, %v598_v4  ;;  %v239_v4 = vld [vmem:[#allocation2 + $0x190] sm:$0xff] }
  0xf2   : > { %v602_v27 = vpop.permute.xlu1 %601 }
 0x173   : > { %v372_v63 = vpop.f32.mrf.mxu0 }
 0x174   : > { %v373_v0 = vadd.f32 %v957_v62, %v372_v63  ;;  %v504_v62 = vmul.f32 %v1580_v40, %v498_v35 }
 0x175   : > { %v1091_v3 = vpop.f32.mrf.mxu0 }
 0x176   : > { %1125 = vmatmul.mubr.f32.vlgmr.msra.gmra.mxu1 %v373_v0  ;;  %v545_v3 = vmul.f32 %v1580_v40, %v542_v34 }
 0x177   : > { %1163 = vmatpush3.msra.mxu1 %v252_v14 }
 0x178   : > { %1164 = vmatprep.subr.mxu1 %v251_v15 }
 0x179   : > { %1165 = vmatpush3.msra.mxu1 %v251_v15  ;;  %v544_v15 = vmul.f32 %v1580_v40, %v538_v32  ;;  %v584_v32 = vmul.f32 %v1580_v40, %v578_v42 }
 0x17a   : > { %1166 = vmatprep.subr.mxu1 %v250_v16 }
 0x17b   : > { %1167 = vmatpush3.msra.mxu1 %v250_v16  ;;  %v608_v16 = vsub.s32 7, %v1575_v39  ;;  %v960_v39 = vld [vmem:[%s1673_s2 + $0x6] ss:$0 sm:$0xff] }
 0x17c   : > { %1168 = vmatprep.subr.mxu1 %v249_v17 }
 0x17d   : > { %1169 = vmatpush3.msra.mxu1 %v249_v17 }
 0x17e   : > { %1170 = vmatprep.subr.mxu1 %v248_v18 }
 0x17f   : > { %1171 = vmatpush3.msra.mxu1 %v248_v18  ;;  %v585_v18 = vmul.f32 %v1580_v40, %v582_v2  ;;  %v268_v2 = vld [vmem:[#allocation2 + $0x270] sm:$0xff] }
 0x180   : > { %1172 = vmatprep.subr.mxu1 %v247_v19 }
 0x181   : > { %1173 = vmatpush3.msra.mxu1 %v247_v19 }
 0x182   : > { %1174 = vmatprep.subr.mxu1 %v246_v20 }
 0x183   : > { %1175 = vmatpush3.msra.mxu1 %v246_v20 }
 0x184   : > { %1176 = vmatprep.subr.mxu1 %v245_v21 }
 0x185   : > { %1177 = vmatpush3.msra.mxu1 %v245_v21 }
 0x186   : > { %1178 = vmatprep.subr.mxu1 %v244_v22 }
 0x187   : > { %1179 = vmatpush3.msra.mxu1 %v244_v22 }
 0x188   : > { %1180 = vmatprep.subr.mxu1 %v243_v23 }
 0x189   : > { %1181 = vmatpush3.msra.mxu1 %v243_v23 }
 0x18a   : > { %1182 = vmatprep.subr.mxu1 %v242_v24 }
 0x18b   : > { %1183 = vmatpush3.msra.mxu1 %v242_v24 }
 0x18c   : > { %1184 = vmatprep.subr.mxu1 %v241_v25 }
 0x18d   : > { %1185 = vmatpush3.msra.mxu1 %v241_v25 }
 0x18e   : > { %1186 = vmatprep.subr.mxu1 %v240_v26 }
 0x18f   : > { %1187 = vmatpush3.msra.mxu1 %v240_v26 }
 0x190   : > { %1188 = vmatprep.subr.mxu1 %v239_v4 }
 0x191   : > { %1189 = vmatpush3.msra.mxu1 %v239_v4 }
 0x236   : > { %v446_v47 = vpop.f32.mrf.mxu1 }
 0x237   : > { %v447_v51 = vadd.f32 %v958_v41, %v446_v47  ;;  %v605_v41 = vmul.f32 %v1580_v40, %v602_v27  ;;  %v254_v27 = vld [vmem:[#allocation2 + $0x200] sm:$0xff] }
 0x238   : > { %v1126_v55 = vpop.f32.mrf.mxu1 }
 0x239   : > { %v469_v58 = vrot.slane %v447_v51, %v468_v44  ;;  %v489_v59 = vrot.slane %v447_v51, %v488_v45  ;;  %v509_v60 = vrot.slane %v447_v51, %v508_v46  ;;  %v529_v63 = vrot.slane %v447_v51, %v528_v48 }
 0x23a   : > { %v549_v0 = vrot.slane %v447_v51, %v548_v49  ;;  %v569_v9 = vrot.slane %v447_v51, %v568_v56  ;;  %v589_v25 = vrot.slane %v447_v51, %v588_v10  ;;  %v609_v43 = vrot.slane %v447_v51, %v608_v16  ;;  %v264_v10 = vld [vmem:[#allocation2 + $0x250] sm:$0xff]  ;;  %v258_v16 = vld [vmem:[#allocation2 + $0x220] sm:$0xff] }
 0x23b   : > { %v471_v5 = vadd.f32 %v469_v58, %v465_v52  ;;  %v491_v6 = vadd.f32 %v489_v59, %v485_v53  ;;  %v511_v1 = vadd.f32 %v509_v60, %v505_v57  ;;  %v531_v8 = vadd.f32 %v529_v63, %v525_v54 }
 0x23c   : > { %v551_v17 = vadd.f32 %v549_v0, %v545_v3  ;;  %v470_v21 = vadd.f32 %v469_v58, %v464_v61  ;;  %v490_v22 = vadd.f32 %v489_v59, %v484_v50  ;;  %v571_v24 = vadd.f32 %v569_v9, %v565_v7  ;;  %v267_v7 = vld [vmem:[#allocation2 + $0x268] sm:$0xff] }
 0x23d   : > { %v473_v13 = vmax.f32 %v471_v5, 0.0  ;;  %v493_v14 = vmax.f32 %v491_v6, 0.0  ;;  %v513_v20 = vmax.f32 %v511_v1, 0.0  ;;  %v533_v23 = vmax.f32 %v531_v8, 0.0  ;;  %v238_v5 = vld [vmem:[#allocation2 + $0x188] sm:$0xff]  ;;  %v237_v6 = vld [vmem:[#allocation2 + $0x180] sm:$0xff] }
 0x23e   : > { %v510_v26 = vadd.f32 %v509_v60, %v504_v62  ;;  %v472_v29 = vmax.f32 %v470_v21, 0.0  ;;  %v492_v30 = vmax.f32 %v490_v22, 0.0  ;;  %v530_v31 = vadd.f32 %v529_v63, %v524_v11  ;;  %1190 = vmatprep.subr.mxu1 %v238_v5  ;;  %v269_v1 = vld [vmem:[#allocation2 + $0x278] sm:$0xff]  ;;  %v266_v8 = vld [vmem:[#allocation2 + $0x260] sm:$0xff]  ;;  %v263_v11 = vld [vmem:[#allocation2 + $0x248] sm:$0xff] }
 0x23f   : > { %v495_v19 = vadd.f32 %v493_v14, %v473_v13  ;;  %v553_v34 = vmax.f32 %v551_v17, 0.0  ;;  %v550_v38 = vadd.f32 %v549_v0, %v544_v15  ;;  %v573_v45 = vmax.f32 %v571_v24, 0.0  ;;  %1191 = vmatpush3.msra.mxu1 %v238_v5  ;;  %1197 = vmatprep.subr.mxu0 %v269_v1  ;;  %v261_v13 = vld [vmem:[#allocation2 + $0x238] sm:$0xff]  ;;  %v260_v14 = vld [vmem:[#allocation2 + $0x230] sm:$0xff]  ;;  %v259_v15 = vld [vmem:[#allocation2 + $0x228] sm:$0xff] }
 0x240   : > { %v494_v36 = vadd.f32 %v492_v30, %v472_v29  ;;  %v512_v37 = vmax.f32 %v510_v26, 0.0  ;;  %v591_v46 = vadd.f32 %v589_v25, %v585_v18  ;;  %v532_v49 = vmax.f32 %v530_v31, 0.0  ;;  %1192 = vmatprep.subr.mxu1 %v237_v6  ;;  %v275_v17 = vld [vmem:[%s1673_s2 + $0x5] sm:$0x1]  ;;  %v257_v24 = vld [vmem:[#allocation2 + $0x218] sm:$0xff]  ;;  %v255_v26 = vld [vmem:[#allocation2 + $0x208] sm:$0xff] }
 0x241   : > { %v515_v28 = vadd.f32 %v513_v20, %v495_v19  ;;  %v570_v50 = vadd.f32 %v569_v9, %v564_v12  ;;  %v590_v53 = vadd.f32 %v589_v25, %v584_v32  ;;  %v552_v42 = vmax.f32 %v550_v38, 0.0  ;;  %1193 = vmatpush3.msra.mxu1 %v237_v6  ;;  %v265_v9 = vld [vmem:[#allocation2 + $0x258] sm:$0xff]  ;;  %v262_v12 = vld [vmem:[#allocation2 + $0x240] sm:$0xff]  ;;  %v256_v25 = vld [vmem:[#allocation2 + $0x210] sm:$0xff] }
 0x242   : > { %v514_v48 = vadd.f32 %v512_v37, %v494_v36  ;;  %v611_v55 = vadd.f32 %v609_v43, %v605_v41  ;;  %v593_v56 = vmax.f32 %v591_v46, 0.0  ;;  %v610_v59 = vadd.f32 %v609_v43, %v604_v33  ;;  %v961_v33 = vld [vmem:[%s1673_s2 + $0x7] ss:$0 sm:$0xff] }
 0x243   : > { %v535_v35 = vadd.f32 %v533_v23, %v515_v28  ;;  %v572_v58 = vmax.f32 %v570_v50, 0.0  ;;  %v592_v61 = vmax.f32 %v590_v53, 0.0  ;;  %v616_v18 = vmul.f32 8.0, %v275_v17 }
 0x244   : > { %v534_v54 = vadd.f32 %v532_v49, %v514_v48  ;;  %v613_v40 = vmax.f32 %v611_v55, 0.0  ;;  %v612_v63 = vmax.f32 %v610_v59, 0.0 }
 0x245   : > { %v555_v47 = vadd.f32 %v553_v34, %v535_v35  ;;  %v620_v19 = vrot.slane %v616_v18, %v468_v44 }
 0x246   : > { %v554_v57 = vadd.f32 %v552_v42, %v534_v54 }
 0x247   : > { %v575_v52 = vadd.f32 %v573_v45, %v555_v47 }
 0x248   : > { %v574_v62 = vadd.f32 %v572_v58, %v554_v57 }
 0x249   : > { %v595_v60 = vadd.f32 %v593_v56, %v575_v52 }
 0x24a   : > { %v594_v51 = vadd.f32 %v592_v61, %v574_v62 }
 0x24b   : > { %v615_v0 = vadd.f32 %v613_v40, %v595_v60 }
 0x24c   : > { %v614_v3 = vadd.f32 %v612_v63, %v594_v51 }
 0x24e   : > { %1159 = vmatprep.mubr.f32.mxu0 %v614_v3 }
 0x24f   : > { %1160 = vmatmul.mubr.f32.vlgmr.msra.gmra.mxu0 %v615_v0 }
 0x250   : > { %1198 = vmatpush3.msra.mxu0 %v269_v1 }
 0x251   : > { %1199 = vmatprep.subr.mxu0 %v268_v2 }
 0x252   : > { %1200 = vmatpush3.msra.mxu0 %v268_v2 }
 0x253   : > { %1201 = vmatprep.subr.mxu0 %v267_v7 }
 0x254   : > { %1202 = vmatpush3.msra.mxu0 %v267_v7 }
 0x255   : > { %1203 = vmatprep.subr.mxu0 %v266_v8 }
 0x256   : > { %1204 = vmatpush3.msra.mxu0 %v266_v8 }
 0x257   : > { %1205 = vmatprep.subr.mxu0 %v265_v9 }
 0x258   : > { %1206 = vmatpush3.msra.mxu0 %v265_v9 }
 0x259   : > { %1207 = vmatprep.subr.mxu0 %v264_v10 }
 0x25a   : > { %1208 = vmatpush3.msra.mxu0 %v264_v10 }
 0x25b   : > { %1209 = vmatprep.subr.mxu0 %v263_v11 }
 0x25c   : > { %1210 = vmatpush3.msra.mxu0 %v263_v11 }
 0x25d   : > { %1211 = vmatprep.subr.mxu0 %v262_v12 }
 0x25e   : > { %1212 = vmatpush3.msra.mxu0 %v262_v12 }
 0x25f   : > { %1213 = vmatprep.subr.mxu0 %v261_v13 }
 0x260   : > { %1214 = vmatpush3.msra.mxu0 %v261_v13 }
 0x261   : > { %1215 = vmatprep.subr.mxu0 %v260_v14 }
 0x262   : > { %1216 = vmatpush3.msra.mxu0 %v260_v14 }
 0x263   : > { %1217 = vmatprep.subr.mxu0 %v259_v15 }
 0x264   : > { %1218 = vmatpush3.msra.mxu0 %v259_v15 }
 0x265   : > { %1219 = vmatprep.subr.mxu0 %v258_v16 }
 0x266   : > { %1220 = vmatpush3.msra.mxu0 %v258_v16 }
 0x267   : > { %1221 = vmatprep.subr.mxu0 %v257_v24 }
 0x268   : > { %1222 = vmatpush3.msra.mxu0 %v257_v24 }
 0x269   : > { %1223 = vmatprep.subr.mxu0 %v256_v25 }
 0x26a   : > { %1224 = vmatpush3.msra.mxu0 %v256_v25 }
 0x26b   : > { %1225 = vmatprep.subr.mxu0 %v255_v26 }
 0x26c   : > { %1226 = vmatpush3.msra.mxu0 %v255_v26 }
 0x26d   : > { %1227 = vmatprep.subr.mxu0 %v254_v27 }
 0x26e   : > { %1228 = vmatpush3.msra.mxu0 %v254_v27 }
 0x30f   : > { %v1161_v20 = vpop.f32.mrf.mxu0 }
 0x310   : > { %v693_v23 = vadd.f32 %v1161_v20, %v620_v19 }
 0x311   : > { %v687_v21 = vpop.f32.mrf.mxu0 }
 0x312   : > { %v688_v22 = vadd.f32 %v687_v21, %v620_v19 }
 0x314   : > { %1194 = vmatprep.mubr.f32.mxu1 %v688_v22 }
 0x315   : > { %1195 = vmatmul.mubr.f32.vlgmr.msra.gmra.mxu1 %v693_v23 }
 0x3d5   : > { %v1196_v44 = vpop.f32.mrf.mxu1 }
 0x3d6   : > { %v772_v28 = vadd.f32 %v1196_v44, %v960_v39 }
 0x3d7   : > { %v766_v29 = vpop.f32.mrf.mxu1 }
 0x3d8   : > { %v767_v30 = vadd.f32 %v960_v39, %v766_v29  ;;  %v776_v32 = vmax.f32 %v772_v28, 0.0 }
 0x3da   : > { %v775_v31 = vmax.f32 %v767_v30, 0.0 }
 0x3dc   : > { %1229 = vmatprep.mubr.f32.mxu0 %v775_v31 }
 0x3dd   : > { %1230 = vmatmul.mubr.f32.vlgmr.msra.gmra.mxu0 %v776_v32 }
 0x49d   : > { %v1231_v34 = vpop.f32.mrf.mxu0 }
 0x49e   : > { %v853_v35 = vadd.f32 %v1231_v34, %v961_v33 }
 0x49f   : > { %v847_v36 = vpop.f32.mrf.mxu0 }
 0x4a0   : > { %857 = vst [vmem:[%s178_s10 + $0x8] sm:$0xff] %v853_v35  ;;  %v848_v37 = vadd.f32 %v961_v33, %v847_v36 }
 0x4a2   : > { %856 = vst [vmem:[%s178_s10] sm:$0xff] %v848_v37 }
 0x4a3   : > { %1350 = shalt.err (!%p1347_p0)
}
 0x4a4   : > { %s1351_s29 = scalar_lea.hbm %s1629_s24, 256  ;;  %s1355_s5 = scalar_lea.hbm %s1674_s3, 512 }
 0x4a5   : > { %p1352_p1 = scmp.ne.s32.totalorder %s1629_s24, %s1351_s29  ;;  %p1356_p4 = scmp.lt.s32.totalorder %s1629_s24, %s1674_s3 }
 0x4a6   : > { %p1357_p7 = scmp.lt.s32.totalorder %s1355_s5, %s1351_s29 }
 0x4a7   : > { %p1353_p2 = pnand %p1352_p1, %p1477_p5 }
 0x4a8   : > { %p1358_p8 = por %p1357_p7, %p1356_p4 }
 0x4a9   : > { %p1354_p3 = pneg %p1353_p2 }
 0x4ab   : > { %p1359_p6 = pnand %p1358_p8, %p1354_p3 }
 0x4ad   : > { %1362 = shalt.err (!%p1359_p6)
}
 0x4ae   : > { %s1417_s8 = smov 128   ;;  %s1418_s9 = smov 8  }
 0x4af   : > { %1236 = dma.vmem_to_hbm [thread:$0]  (%p1477_p5), %s1624_s11, 256, %s1629_s24, %s1631_s25, %s1417_s8, %s1417_s8, %s1418_s9  }
 0x4b0 PF: > { %p1248_p9 = scmp.ge.s32.totalorder %s1401_s15, 2  ;;  %s887_s10 = sand.u32 1, %s1389_s12  }
 0x4b1   : > { %p1678_p10 = scmp.ne.s32.totalorder %s1676_s23, 0  ;;  %s888_s17 = scalar_lea.sflag [#allocation4], %s887_s10 }
 0x4b3   : > { %p1243_p11 = pnand %p1248_p9, %p1678_p10 }
 0x4b5   : > { %p1244_p12 = pneg %p1243_p11 }
 0x4b7   : > { %1384 = dma.done.wait (%p1244_p12), %s888_s17, 256  }
 0x4b8   : > { %1386 = vsyncadd (%p1244_p12), %s888_s17, 4294967040  ;;  %p14_p13 = scmp.ge.s32.totalorder %s1464_s18, 4   ;;  %s1679_s12 = smov %s1393_s13 }
 0x4b9   : > { %s1680_s13 = smov %s1397_s14  ;;  %s1681_s14 = smov %s1475_s21 }
 0x4ba   : > { %s1682_s15 = smov %s1464_s18  ;;  %16 = sbr.rel (!%p14_p13) target bundleno = 4 (0x4), region = 76 }
 0x4bf   :  { %893 = vsyncpa [#allocation3], 1 }
 0x4c0   :  { %895 = vsyncpa [#allocation3 + $0x1], 1 }
 0x4c1   :  { %896 = vsyncpa [#allocation4], 1 }
 0x4c2   :  { %898 = vsyncpa [#allocation4 + $0x1], 1 }

</bundles_post_ra>
